<compile_context>
chip_gen: v6e
topology: v6e:2x2x1
jax: 0.10.0
libtpu: 0.0.40
codegen_flags: <defaults>
</compile_context>

<pallas_src>
import numpy as np
import jax
import jax.numpy as jnp
from jax.experimental import pallas as pl
from jax.experimental.pallas import tpu as pltpu


def _round_up(x, m):
    return ((x + m - 1) // m) * m


def _cdiv(a, b):
    return -(-a // b)


def _make_rnn_optimizer_kernel(preproc, use_second_layer, no_tanh,
                               preproc_factor, hidden_sz):
    H = hidden_sz
    thresh = float(np.exp(-preproc_factor))
    expf = float(np.exp(preproc_factor))
    inv_pf = float(1.0 / preproc_factor)

    def lstm_gates_to_hc(gates, c):
        # Single full-vreg EUP pass (sigmoid) over the packed (TB, 4H)
        # pre-activation.  The g-gate columns were pre-scaled by 2 on the
        # host, so tanh(z) == 2*sigmoid(2z) - 1 comes from the same pass.
        sg = jax.nn.sigmoid(gates)
        i_g = sg[:, 0:H]
        f_g = sg[:, H:2 * H]
        g_g = 2.0 * sg[:, 2 * H:3 * H] - 1.0
        o_g = sg[:, 3 * H:4 * H]
        c_new = f_g * c + i_g * g_g
        h_new = o_g * jnp.tanh(c_new)
        return h_new, c_new

    def kernel(*refs):
        it = iter(refs)
        inp_ref = next(it)
        h0_ref = next(it)
        c0_ref = next(it)
        if use_second_layer:
            h1_ref = next(it)
            c1_ref = next(it)
        if preproc:
            w1a_ref = next(it)
            w1b_ref = next(it)
        else:
            w1x_ref = next(it)
        w1h_ref = next(it)
        b1_ref = next(it)
        if use_second_layer:
            w2x_ref = next(it)
            w2h_ref = next(it)
            b2_ref = next(it)
        wout_ref = next(it)
        out_ref = next(it)

        x = inp_ref[...].astype(jnp.float32)
        h0 = h0_ref[...].astype(jnp.float32)
        c0 = c0_ref[...].astype(jnp.float32)

        if preproc:
            # Elementwise log/sign gradient preprocessing (matches the PyTorch
            # masked-assignment formulation).  No lane concat: each half feeds
            # its own small matmul.
            ax = jnp.abs(x)
            keep = ax >= thresh
            sign_x = jnp.where(x > 0, 1.0, jnp.where(x < 0, -1.0, 0.0))
            x_a = jnp.where(keep, jnp.log(ax + 1e-8) * inv_pf, -1.0)
            x_b = jnp.where(keep, sign_x, expf * x)
            gates1 = (
                jnp.dot(x_a, w1a_ref[...], preferred_element_type=jnp.float32)
                + jnp.dot(x_b, w1b_ref[...], preferred_element_type=jnp.float32)
                + jnp.dot(h0, w1h_ref[...], preferred_element_type=jnp.float32)
                + b1_ref[...])
        else:
            gates1 = (
                jnp.dot(x, w1x_ref[...], preferred_element_type=jnp.float32)
                + jnp.dot(h0, w1h_ref[...], preferred_element_type=jnp.float32)
                + b1_ref[...])

        h0n, c0n = lstm_gates_to_hc(gates1, c0)

        if use_second_layer:
            h1 = h1_ref[...].astype(jnp.float32)
            c1 = c1_ref[...].astype(jnp.float32)
            gates2 = (
                jnp.dot(h0n, w2x_ref[...], preferred_element_type=jnp.float32)
                + jnp.dot(h1, w2h_ref[...], preferred_element_type=jnp.float32)
                + b2_ref[...])
            h1n, c1n = lstm_gates_to_hc(gates2, c1)
            top = h1n
        else:
            top = h0n

        out = jnp.dot(top, wout_ref[...], preferred_element_type=jnp.float32)
        act = out if no_tanh else jnp.tanh(out)

        # Single packed output slab: [act | h0n | c0n (| h1n | c1n)].
        dt = out_ref.dtype
        out_ref[:, 0:3] = act.astype(dt)
        out_ref[:, 3:3 + H] = h0n.astype(dt)
        out_ref[:, 3 + H:3 + 2 * H] = c0n.astype(dt)
        if use_second_layer:
            out_ref[:, 3 + 2 * H:3 + 3 * H] = h1n.astype(dt)
            out_ref[:, 3 + 3 * H:3 + 4 * H] = c1n.astype(dt)

    return kernel


class RNNOptimizerPallas:
    """JAX/Pallas port of the PyTorch RNNOptimizer forward pass."""

    def __init__(self, preproc=False, hidden_sz=20, preproc_factor=10.0,
                 use_second_layer=False, n_features=4, no_tanh=False,
                 learnable_scale=False, key=None, batch_tile=2048,
                 io_dtype=jnp.float32):
        del learnable_scale  # unused in the reference forward pass
        self.preproc = preproc
        self.hidden_sz = hidden_sz
        self.preproc_factor = preproc_factor
        self.use_second_layer = use_second_layer
        self.n_features = n_features
        self.no_tanh = no_tanh
        self.io_dtype = io_dtype
        # Keep the batch tile a multiple of 8 (sublane divisibility rule).
        self.batch_tile = max(8, _round_up(int(batch_tile), 8))

        if key is None:
            key = jax.random.PRNGKey(0)
        H = hidden_sz
        F = n_features
        F_in = 2 * F if preproc else F
        bound = 1.0 / np.sqrt(H)  # PyTorch default U(-1/sqrt(H), 1/sqrt(H))
        keys = jax.random.split(key, 9)

        def u(k, shape):
            return jax.random.uniform(k, shape, jnp.float32, -bound, bound)

        # PyTorch parameter layouts: weight_ih (4H, in), weight_hh (4H, H),
        # biases (4H,), output Linear weight (3, H) with no bias.
        w_ih1 = u(keys[0], (4 * H, F_in))
        w_hh1 = u(keys[1], (4 * H, H))
        b_ih1 = u(keys[2], (4 * H,))
        b_hh1 = u(keys[3], (4 * H,))
        w_ih2 = u(keys[4], (4 * H, H))
        w_hh2 = u(keys[5], (4 * H, H))
        b_ih2 = u(keys[6], (4 * H,))
        b_hh2 = u(keys[7], (4 * H,))
        w_out = u(keys[8], (3, H))

        # Unscaled transposed params kept for the pure-JAX reference.
        self.ref_params = dict(
            w_ih1=jnp.transpose(w_ih1), w_hh1=jnp.transpose(w_hh1),
            b1=(b_ih1 + b_hh1).reshape(1, 4 * H),
            w_ih2=jnp.transpose(w_ih2), w_hh2=jnp.transpose(w_hh2),
            b2=(b_ih2 + b_hh2).reshape(1, 4 * H),
            wout=jnp.transpose(w_out))

        # Kernel layouts: transposed (in, 4H) / (H, 4H), bias pre-summed, and
        # the g-gate columns (2H:3H) pre-scaled by 2 so one in-kernel sigmoid
        # pass covers all four gates (tanh recovered as 2*sigmoid(2z)-1).
        gscale = jnp.concatenate([
            jnp.ones((2 * H,), jnp.float32),
            jnp.full((H,), 2.0, jnp.float32),
            jnp.ones((H,), jnp.float32)])

        w1x = jnp.transpose(w_ih1) * gscale            # (F_in, 4H)
        self.w1h = jnp.transpose(w_hh1) * gscale       # (H, 4H)
        self.b1 = self.ref_params["b1"] * gscale       # (1, 4H)
        if preproc:
            self.w1a = w1x[:F]                          # log-magnitude half
            self.w1b = w1x[F:2 * F]                     # sign half
        else:
            self.w1x = w1x
        self.w2x = jnp.transpose(w_ih2) * gscale
        self.w2h = jnp.transpose(w_hh2) * gscale
        self.b2 = self.ref_params["b2"] * gscale
        self.wout = self.ref_params["wout"]             # (H, 3)

        self._kernel = _make_rnn_optimizer_kernel(
            preproc, use_second_layer, no_tanh, preproc_factor, hidden_sz)

    # ----------------------------------------------------------------- tiling
    def _pick_tile(self, B):
        B8 = _round_up(max(B, 1), 8)
        cap = min(self.batch_tile, B8)
        if B8 > 8:
            # Keep >=2 grid steps so v7x's two TensorCores both get work and
            # the BlockSpec pipeline stays warm.
            cap = min(cap, _round_up(_cdiv(B8, 2), 8))
        cap = max(cap, 8)
        tb = cap
        # Bounded search for a tile that evenly divides the batch (avoids the
        # host-side full-array pad and output [:B] slice copies entirely).
        for cand in range(cap, max(8, cap - 64 * 8) - 1, -8):
            if B8 % cand == 0:
                tb = cand
                break
        return tb

    def __call__(self, inp, hidden, cell):
        B = inp.shape[0]
        F_raw = inp.shape[1]
        H = self.hidden_sz
        io_dt = self.io_dtype

        TB = self._pick_tile(B)
        Bp = _round_up(B, TB)

        def prep(a):
            a = a.astype(io_dt)
            if a.shape[0] != Bp:
                a = jnp.pad(a, ((0, Bp - a.shape[0]), (0, 0)))
            return a

        inputs = [prep(inp), prep(hidden[0]), prep(cell[0])]
        if self.use_second_layer:
            inputs += [prep(hidden[1]), prep(cell[1])]
        if self.preproc:
            inputs += [self.w1a, self.w1b]
        else:
            inputs += [self.w1x]
        inputs += [self.w1h, self.b1]
        if self.use_second_layer:
            inputs += [self.w2x, self.w2h, self.b2]
        inputs += [self.wout]

        def row_spec(ncols):
            return pl.BlockSpec((TB, ncols), lambda i: (i, 0))

        def fixed_spec(a):
            return pl.BlockSpec(a.shape, lambda i: (0, 0))

        in_specs = [row_spec(F_raw), row_spec(H), row_spec(H)]
        if self.use_second_layer:
            in_specs += [row_spec(H), row_spec(H)]
        n_rowlike = 5 if self.use_second_layer else 3
        in_specs += [fixed_spec(a) for a in inputs[n_rowlike:]]

        out_w = 3 + (4 * H if self.use_second_layer else 2 * H)
        out_shape = jax.ShapeDtypeStruct((Bp, out_w), io_dt)

        slab = pl.pallas_call(
            self._kernel,
            out_shape=out_shape,
            grid_spec=pltpu.PrefetchScalarGridSpec(
                num_scalar_prefetch=0,
                grid=(Bp // TB,),
                in_specs=in_specs,
                out_specs=row_spec(out_w)),
            compiler_params=pltpu.CompilerParams(
                dimension_semantics=("parallel",),
                vmem_limit_bytes=32 * 1024 * 1024),
        )(*inputs)

        if Bp != B:
            slab = slab[:B]
        act = slab[:, 0:3]
        h0n = slab[:, 3:3 + H]
        c0n = slab[:, 3 + H:3 + 2 * H]
        if self.use_second_layer:
            h1n = slab[:, 3 + 2 * H:3 + 3 * H]
            c1n = slab[:, 3 + 3 * H:3 + 4 * H]
            return act, [1, 1], (h0n, h1n), (c0n, c1n)
        return act, [1, 1], (h0n,), (c0n,)


def reference_forward(model, inp, hidden, cell):
    """Pure-JAX reference (standard LSTMCell math) for numeric verification."""
    H = model.hidden_sz
    p = model.ref_params
    hp = jax.lax.Precision.HIGHEST
    x = inp.astype(jnp.float32)
    if model.preproc:
        ax = jnp.abs(x)
        keep = ax >= np.exp(-model.preproc_factor)
        xa = jnp.where(keep, jnp.log(ax + 1e-8) / model.preproc_factor, -1.0)
        xb = jnp.where(keep, jnp.sign(x),
                       float(np.exp(model.preproc_factor)) * x)
        x = jnp.concatenate([xa, xb], axis=1)

    def cell_fn(xin, h, c, w_ih, w_hh, b):
        gates = (jnp.dot(xin, w_ih, precision=hp)
                 + jnp.dot(h, w_hh, precision=hp) + b)
        i_g = jax.nn.sigmoid(gates[:, 0:H])
        f_g = jax.nn.sigmoid(gates[:, H:2 * H])
        g_g = jnp.tanh(gates[:, 2 * H:3 * H])
        o_g = jax.nn.sigmoid(gates[:, 3 * H:4 * H])
        c_new = f_g * c + i_g * g_g
        return o_g * jnp.tanh(c_new), c_new

    h0n, c0n = cell_fn(x, hidden[0], cell[0], p["w_ih1"], p["w_hh1"], p["b1"])
    top = h0n
    extra = ()
    if model.use_second_layer:
        h1n, c1n = cell_fn(h0n, hidden[1], cell[1],
                           p["w_ih2"], p["w_hh2"], p["b2"])
        top = h1n
        extra = (h1n, c1n)
    out = jnp.dot(top, p["wout"], precision=hp)
    act = out if model.no_tanh else jnp.tanh(out)
    return (act, h0n, c0n) + extra


if __name__ == "__main__":
    B, F, H = 8, 4, 20  # batch of parameters, n_features, hidden_sz (defaults)
    key = jax.random.PRNGKey(0)
    k_inp, k_h0, k_c0, k_h1, k_c1, k_w1, k_w2 = jax.random.split(key, 7)

    inp = jax.random.normal(k_inp, (B, F), jnp.float32) * 0.1
    # Scale half the rows way down so the preproc threshold branch is hit.
    scale = jnp.where(jnp.arange(B)[:, None] < B // 2, 1.0, 1e-6)
    inp = inp * scale
    h0 = jax.random.normal(k_h0, (B, H), jnp.float32) * 0.1
    c0 = jax.random.normal(k_c0, (B, H), jnp.float32) * 0.1
    h1 = jax.random.normal(k_h1, (B, H), jnp.float32) * 0.1
    c1 = jax.random.normal(k_c1, (B, H), jnp.float32) * 0.1

    # Config A: module defaults (no preproc, single LSTM layer, tanh output).
    model_a = RNNOptimizerPallas(preproc=False, hidden_sz=H, n_features=F,
                                 use_second_layer=False, no_tanh=False,
                                 key=k_w1)
    act_a, _, hid_a, cel_a = model_a(inp, (h0,), (c0,))
    jax.block_until_ready((act_a, hid_a, cel_a))
    ra, rh0, rc0 = reference_forward(model_a, inp, (h0,), (c0,))
    np.testing.assert_allclose(np.asarray(act_a), np.asarray(ra),
                               rtol=1e-4, atol=1e-4)
    np.testing.assert_allclose(np.asarray(hid_a[0]), np.asarray(rh0),
                               rtol=1e-4, atol=1e-4)
    np.testing.assert_allclose(np.asarray(cel_a[0]), np.asarray(rc0),
                               rtol=1e-4, atol=1e-4)

    # Config B: gradient preprocessing + second LSTM layer.
    model_b = RNNOptimizerPallas(preproc=True, hidden_sz=H, n_features=F,
                                 use_second_layer=True, no_tanh=False,
                                 key=k_w2)
    act_b, _, hid_b, cel_b = model_b(inp, (h0, h1), (c0, c1))
    jax.block_until_ready((act_b, hid_b, cel_b))
    rb, rbh0, rbc0, rbh1, rbc1 = reference_forward(model_b, inp, (h0, h1),
                                                   (c0, c1))
    np.testing.assert_allclose(np.asarray(act_b), np.asarray(rb),
                               rtol=1e-4, atol=1e-4)
    np.testing.assert_allclose(np.asarray(hid_b[0]), np.asarray(rbh0),
                               rtol=1e-4, atol=1e-4)
    np.testing.assert_allclose(np.asarray(cel_b[0]), np.asarray(rbc0),
                               rtol=1e-4, atol=1e-4)
    np.testing.assert_allclose(np.asarray(hid_b[1]), np.asarray(rbh1),
                               rtol=1e-4, atol=1e-4)
    np.testing.assert_allclose(np.asarray(cel_b[1]), np.asarray(rbc1),
                               rtol=1e-4, atol=1e-4)

    print("KERNEL_OK")
</pallas_src>

<mosaic_0001>
module attributes {stable_mosaic.version = 11 : i64} {
  func.func @kernel(%arg0: i32, %arg1: memref<8x4xf32, #tpu.memory_space<vmem>>, %arg2: memref<8x20xf32, #tpu.memory_space<vmem>>, %arg3: memref<8x20xf32, #tpu.memory_space<vmem>>, %arg4: memref<4x80xf32, #tpu.memory_space<vmem>>, %arg5: memref<20x80xf32, #tpu.memory_space<vmem>>, %arg6: memref<1x80xf32, #tpu.memory_space<vmem>>, %arg7: memref<20x3xf32, #tpu.memory_space<vmem>>, %arg8: memref<8x43xf32, #tpu.memory_space<vmem>>) attributes {dimension_semantics = [#tpu.dimension_semantics<parallel>], iteration_bounds = array<i64: 1>, scalar_prefetch = 0 : i64, scratch_operands = 0 : i64, tpu.core_type = #tpu.core_type<tc>, window_params = [{transform_indices = @transform_0, window_bounds = array<i64: 8, 4>}, {transform_indices = @transform_1, window_bounds = array<i64: 8, 20>}, {transform_indices = @transform_2, window_bounds = array<i64: 8, 20>}, {pipeline_mode = #tpu.pipeline_mode<synchronous>, transform_indices = @transform_3, window_bounds = array<i64: 4, 80>}, {pipeline_mode = #tpu.pipeline_mode<synchronous>, transform_indices = @transform_4, window_bounds = array<i64: 20, 80>}, {pipeline_mode = #tpu.pipeline_mode<synchronous>, transform_indices = @transform_5, window_bounds = array<i64: 1, 80>}, {pipeline_mode = #tpu.pipeline_mode<synchronous>, transform_indices = @transform_6, window_bounds = array<i64: 20, 3>}, {transform_indices = @transform_7, window_bounds = array<i64: 8, 43>}]} {
    %c0 = arith.constant 0 : index
    %c0_0 = arith.constant 0 : index
    %0 = vector.load %arg1[%c0, %c0_0] : memref<8x4xf32, #tpu.memory_space<vmem>>, vector<8x4xf32>
    %c0_1 = arith.constant 0 : index
    %c0_2 = arith.constant 0 : index
    %1 = vector.load %arg2[%c0_1, %c0_2] : memref<8x20xf32, #tpu.memory_space<vmem>>, vector<8x20xf32>
    %c0_3 = arith.constant 0 : index
    %c0_4 = arith.constant 0 : index
    %2 = vector.load %arg3[%c0_3, %c0_4] : memref<8x20xf32, #tpu.memory_space<vmem>>, vector<8x20xf32>
    %c0_5 = arith.constant 0 : index
    %c0_6 = arith.constant 0 : index
    %3 = vector.load %arg4[%c0_5, %c0_6] : memref<4x80xf32, #tpu.memory_space<vmem>>, vector<4x80xf32>
    %cst = arith.constant dense<0.000000e+00> : vector<8x80xf32>
    %4 = tpu.matmul %0, %3, %cst {dimension_numbers = #tpu.dot_dimension_numbers<[1], [0], [0], [1], [0, 0, 1, 1], [], []>} : vector<8x4xf32>, vector<4x80xf32>, vector<8x80xf32> -> vector<8x80xf32>
    %c0_7 = arith.constant 0 : index
    %c0_8 = arith.constant 0 : index
    %5 = vector.load %arg5[%c0_7, %c0_8] : memref<20x80xf32, #tpu.memory_space<vmem>>, vector<20x80xf32>
    %cst_9 = arith.constant dense<0.000000e+00> : vector<8x80xf32>
    %6 = tpu.matmul %1, %5, %cst_9 {dimension_numbers = #tpu.dot_dimension_numbers<[1], [0], [0], [1], [0, 0, 1, 1], [], []>} : vector<8x20xf32>, vector<20x80xf32>, vector<8x80xf32> -> vector<8x80xf32>
    %7 = arith.addf %4, %6 : vector<8x80xf32>
    %c0_10 = arith.constant 0 : index
    %c0_11 = arith.constant 0 : index
    %8 = vector.load %arg6[%c0_10, %c0_11] : memref<1x80xf32, #tpu.memory_space<vmem>>, vector<1x80xf32>
    %9 = vector.broadcast %8 : vector<1x80xf32> to vector<8x80xf32>
    %10 = arith.addf %7, %9 : vector<8x80xf32>
    %11 = arith.negf %10 : vector<8x80xf32>
    %12 = math.exp %11 : vector<8x80xf32>
    %cst_12 = arith.constant 1.000000e+00 : f32
    %13 = vector.broadcast %cst_12 : f32 to vector<8x80xf32>
    %14 = arith.addf %13, %12 : vector<8x80xf32>
    %15 = arith.divf %13, %14 : vector<8x80xf32>
    %16 = vector.extract_strided_slice %15 {offsets = [0, 0], sizes = [8, 20], strides = [1, 1]} : vector<8x80xf32> to vector<8x20xf32>
    %17 = vector.extract_strided_slice %15 {offsets = [0, 20], sizes = [8, 20], strides = [1, 1]} : vector<8x80xf32> to vector<8x20xf32>
    %18 = vector.extract_strided_slice %15 {offsets = [0, 40], sizes = [8, 20], strides = [1, 1]} : vector<8x80xf32> to vector<8x20xf32>
    %cst_13 = arith.constant 2.000000e+00 : f32
    %19 = vector.broadcast %cst_13 : f32 to vector<8x20xf32>
    %20 = arith.mulf %19, %18 : vector<8x20xf32>
    %cst_14 = arith.constant 1.000000e+00 : f32
    %21 = vector.broadcast %cst_14 : f32 to vector<8x20xf32>
    %22 = arith.subf %20, %21 : vector<8x20xf32>
    %23 = vector.extract_strided_slice %15 {offsets = [0, 60], sizes = [8, 20], strides = [1, 1]} : vector<8x80xf32> to vector<8x20xf32>
    %24 = arith.mulf %17, %2 : vector<8x20xf32>
    %25 = arith.mulf %16, %22 : vector<8x20xf32>
    %26 = arith.addf %24, %25 : vector<8x20xf32>
    %27 = math.tanh %26 : vector<8x20xf32>
    %28 = arith.mulf %23, %27 : vector<8x20xf32>
    %c0_15 = arith.constant 0 : index
    %c0_16 = arith.constant 0 : index
    %29 = vector.load %arg7[%c0_15, %c0_16] : memref<20x3xf32, #tpu.memory_space<vmem>>, vector<20x3xf32>
    %cst_17 = arith.constant dense<0.000000e+00> : vector<8x3xf32>
    %30 = tpu.matmul %28, %29, %cst_17 {dimension_numbers = #tpu.dot_dimension_numbers<[1], [0], [0], [1], [0, 0, 1, 1], [], []>} : vector<8x20xf32>, vector<20x3xf32>, vector<8x3xf32> -> vector<8x3xf32>
    %31 = math.tanh %30 : vector<8x3xf32>
    %c0_18 = arith.constant 0 : index
    %c0_19 = arith.constant 0 : index
    %32 = vector.load %arg8[%c0_18, %c0_19] : memref<8x43xf32, #tpu.memory_space<vmem>>, vector<8x3xf32>
    tpu.vector_store %arg8[%c0_18, %c0_19], %31 {strides = array<i32>} : memref<8x43xf32, #tpu.memory_space<vmem>>, vector<8x3xf32>,
    %c0_20 = arith.constant 0 : index
    %c3 = arith.constant 3 : index
    %33 = vector.load %arg8[%c0_20, %c3] : memref<8x43xf32, #tpu.memory_space<vmem>>, vector<8x20xf32>
    tpu.vector_store %arg8[%c0_20, %c3], %28 {strides = array<i32>} : memref<8x43xf32, #tpu.memory_space<vmem>>, vector<8x20xf32>,
    %c0_21 = arith.constant 0 : index
    %c23 = arith.constant 23 : index
    %34 = vector.load %arg8[%c0_21, %c23] : memref<8x43xf32, #tpu.memory_space<vmem>>, vector<8x20xf32>
    tpu.vector_store %arg8[%c0_21, %c23], %26 {strides = array<i32>} : memref<8x43xf32, #tpu.memory_space<vmem>>, vector<8x20xf32>,
    return
  }
  func.func @transform_0(%arg0: i32) -> (i32, i32) {
    %c0_i32 = arith.constant 0 : i32
    %c0_i32_0 = arith.constant 0 : i32
    return %arg0, %c0_i32 : i32, i32
  }
  func.func @transform_1(%arg0: i32) -> (i32, i32) {
    %c0_i32 = arith.constant 0 : i32
    %c0_i32_0 = arith.constant 0 : i32
    return %arg0, %c0_i32 : i32, i32
  }
  func.func @transform_2(%arg0: i32) -> (i32, i32) {
    %c0_i32 = arith.constant 0 : i32
    %c0_i32_0 = arith.constant 0 : i32
    return %arg0, %c0_i32 : i32, i32
  }
  func.func @transform_3(%arg0: i32) -> (i32, i32) {
    %c0_i32 = arith.constant 0 : i32
    %c0_i32_0 = arith.constant 0 : i32
    %c0_i32_1 = arith.constant 0 : i32
    return %c0_i32, %c0_i32_0 : i32, i32
  }
  func.func @transform_4(%arg0: i32) -> (i32, i32) {
    %c0_i32 = arith.constant 0 : i32
    %c0_i32_0 = arith.constant 0 : i32
    %c0_i32_1 = arith.constant 0 : i32
    return %c0_i32, %c0_i32_0 : i32, i32
  }
  func.func @transform_5(%arg0: i32) -> (i32, i32) {
    %c0_i32 = arith.constant 0 : i32
    %c0_i32_0 = arith.constant 0 : i32
    %c0_i32_1 = arith.constant 0 : i32
    return %c0_i32, %c0_i32_0 : i32, i32
  }
  func.func @transform_6(%arg0: i32) -> (i32, i32) {
    %c0_i32 = arith.constant 0 : i32
    %c0_i32_0 = arith.constant 0 : i32
    %c0_i32_1 = arith.constant 0 : i32
    return %c0_i32, %c0_i32_0 : i32, i32
  }
  func.func @transform_7(%arg0: i32) -> (i32, i32) {
    %c0_i32 = arith.constant 0 : i32
    %c0_i32_0 = arith.constant 0 : i32
    return %arg0, %c0_i32 : i32, i32
  }
}

</mosaic_0001>

<bundles_post_ra>
// kernel: tpu_custom_call.1
= control target key start
LH: loop header
LB: loop body
LE: loop exit
PB: predicated region body
PF: predicated region fallthrough
CT: control target
= control target key end

     0   :  { %vm38_vm0 = vcmask 1043456   ;;  %v416_v1 = vmov 0.0   ;;  %vm112_vm1 = vcmask 31744   ;;  %s506_s0 = inlined_call_operand.vmem [shape: f32[8,4], index: 0, kind: input, shape index: {}]   ;;  %s507_s1 = inlined_call_operand.vmem [shape: f32[8,20], index: 1, kind: input, shape index: {}]   ;;  %s508_s2 = inlined_call_operand.vmem [shape: f32[8,20], index: 2, kind: input, shape index: {}]   ;;  %s509_s3 = inlined_call_operand.vmem [shape: f32[4,80], index: 3, kind: input, shape index: {}]   ;;  %s510_s4 = inlined_call_operand.vmem [shape: f32[20,80], index: 4, kind: input, shape index: {}]   ;;  %s511_s5 = inlined_call_operand.vmem [shape: f32[1,80], index: 5, kind: input, shape index: {}]   ;;  %s512_s6 = inlined_call_operand.vmem [shape: f32[20,3], index: 6, kind: input, shape index: {}]   ;;  %s513_s7 = inlined_call_operand.hbm [shape: f32[8,43], index: 7, kind: output, shape index: {}]  }
   0x1   :  { %v33_v0 = vld [vmem:[%s510_s4 + $0x10] sm:$0xf]  ;;  %354 = vmatprep.subr.mxu0 %v416_v1  ;;  %363 = vmatprep.subr.mxu1 %v416_v1  ;;  %v32_v2 = vld [vmem:[%s510_s4 + $0x8] sm:$0xff]  ;;  %v30_v3 = vld [vmem:[%s509_s3] sm:$0xf] }
   0x2   :  { %v27_v4 = vld [vmem:[%s506_s0] sm:$0xff]  ;;  %355 = vmatpush3.msk.msra.mxu0 %vm38_vm0, %v33_v0  ;;  %364 = vmatpush3.msk.msra.mxu1 %vm38_vm0, %v30_v3 }
   0x3   :  { %12 = vsyncpa [#allocation3], 0  ;;  %356 = vmatprep.subr.mxu0 %v416_v1  ;;  %vm417_vm2 = vmmov 0   ;;  %v31_v5 = vld [vmem:[%s510_s4] sm:$0xff]  ;;  %vm34_vm3 = vcmask 162816   ;;  %368 = vmatprep.subr.mxu1 %v416_v1  ;;  %s419_s14 = smov 20  }
   0x4   :  { %365 = vmatprep.mubr.msk.f32.mxu1 %vm417_vm2, %v416_v1  ;;  %357 = vmatpush3.msra.mxu0 %v32_v2  ;;  %v28_v6 = vld [vmem:[%s507_s1] sm:$0xff]  ;;  %s418_s1 = smov 88   ;;  %v228_v27 = vld [vmem:[%s512_s6 + $0x10] sm:$0xf]  ;;  %v227_v28 = vld [vmem:[%s512_s6 + $0x8] sm:$0xff]  ;;  %s420_s19 = smov 40  }
   0x5   :  { %366 = vmatmul.mubr.msk.f32.vlgmr.msra.gmra.mxu1 %vm112_vm1, %v27_v4  ;;  %358 = vmatprep.subr.mxu0 %v416_v1  ;;  %v339_v10 = vld [vmem:[%s511_s5] ss:$0 sm:$0xff]  ;;  %s421_s20 = smov 71   ;;  %s422_s21 = smov 68   ;;  %vm308_vm4 = vcmask 23552   ;;  %vm313_vm5 = vcmask 187416  }
   0x6   :  { %360 = vmatprep.mubr.msk.f32.mxu0 %vm417_vm2, %v416_v1  ;;  %359 = vmatpush3.msra.mxu0 %v31_v5  ;;  %v29_v20 = vld [vmem:[%s508_s2] sm:$0xff]  ;;  %s423_s22 = smov 3   ;;  %vm319_vm6 = vcmask 351416  }
   0x7   :  { %361 = vmatmul.mubr.msk.f32.vlgmr.msra.gmra.mxu0 %vm34_vm3, %v28_v6  ;;  %374 = vmatprep.mubr.msk.f32.mxu1 %vm417_vm2, %v416_v1  ;;  %v226_v29 = vld [vmem:[%s512_s6] sm:$0xff]  ;;  %s424_s6 = smov [#allocation2]  }
   0x8   :  { %369 = vmatpush3.msk.msra.mxu1 %vm38_vm0, %v228_v27  ;;  %s327_s23 = sshll.u32 %s424_s6, 4  ;;  %s328_s23 = int_to_ptr.vmem [resolvable:$true] %s327_s23 }
   0x9   :  { %370 = vmatprep.subr.mxu1 %v416_v1  ;;  %s394_s24 = scalar_lea.vmem %s328_s23, 128  ;;  %p399_p1 = scmp.lt.s32.totalorder %s328_s23, %s328_s23 }
   0xa   :  { %371 = vmatpush3.msra.mxu1 %v227_v28  ;;  %p395_p0 = scmp.ne.s32.totalorder %s328_s23, %s394_s24  ;;  %p400_p2 = scmp.lt.s32.totalorder %s394_s24, %s394_s24 }
   0xb   :  { %372 = vmatprep.subr.mxu1 %v416_v1 }
   0xc   :  { %373 = vmatpush3.msra.mxu1 %v226_v29  ;;  %p401_p3 = por %p400_p2, %p399_p1 }
   0xe   :  { %p402_p4 = pnand %p401_p3, %p395_p0 }
  0xc5   :  { %v185_v7 = vpop.f32.mrf.mxu1 }
  0xc7   :  { %v367_v8 = vpop.f32.mrf.mxu1  ;;  %v108_v9 = vpop.f32.mrf.mxu0 }
  0xc8   :  { %v186_v11 = vadd.f32 %v185_v7, %v108_v9 }
  0xc9   :  { %v362_v12 = vpop.f32.mrf.mxu0 }
  0xca   :  { %v196_v13 = vadd.f32 %v339_v10, %v186_v11 }
  0xcc   :  { %v340_v14 = vmul.f32 -1.442695, %v196_v13 }
  0xce   :  { %386 = vpow2.f32 %v340_v14 }
  0xdb   :  { %v387_v15 = vpop.eup %386 }
  0xdc   :  { %v200_v16 = vadd.f32 1.0, %v387_v15 }
  0xde   :  { %388 = vrcp.f32 %v200_v16 }
  0xeb   :  { %v389_v17 = vpop.eup %388 }
  0xec   :  { %v203_v18 = vmul.f32 2.0, %v389_v17 }
  0xee   :  { %v341_v19 = vadd.f32 -1.0, %v203_v18 }
  0xf0   :  { %211 = vrot.lane.b32.xlu0 %v341_v19, %s418_s1 }
  0xf4   :  { %206 = vrot.lane.b32.xlu0 %v29_v20, %s419_s14 }
 0x162   :  { %v212_v21 = vpop.permute.xlu0 %211 }
 0x163   :  { %v214_v22 = vmul.f32 %v389_v17, %v212_v21 }
 0x165   :  { %216 = vrot.lane.b32.xlu1 %v214_v22, %s419_s14 }
 0x166   :  { %v207_v23 = vpop.permute.xlu0 %206 }
 0x167   :  { %v209_v24 = vmul.f32 %v389_v17, %v207_v23 }
 0x1d7   :  { %v217_v25 = vpop.permute.xlu1 %216 }
 0x1d8   :  { %v219_v26 = vadd.f32 %v217_v25, %v209_v24 }
 0x1da   :  { %390 = vtanh.f32 %v219_v26 }
 0x1e7   :  { %v391_v30 = vpop.eup %390 }
 0x1e8   :  { %222 = vrot.lane.b32.xlu1 %v391_v30, %s420_s19 }
 0x25a   :  { %v223_v31 = vpop.permute.xlu1 %222 }
 0x25b   :  { %v225_v32 = vmul.f32 %v389_v17, %v223_v31 }
 0x25d   :  { %310 = vrot.lane.b32.xlu1 %v225_v32, %s421_s20  ;;  %230 = vrot.lane.b32.xlu0 %v225_v32, %s422_s21 }
 0x261   :  { %316 = vrot.lane.b32.xlu0 %v219_v26, %s423_s22 }
 0x2cf   :  { %v231_v33 = vpop.permute.xlu0 %230  ;;  %v311_v37 = vpop.permute.xlu1 %310 }
 0x2d0   :  { %375 = vmatmul.mubr.msk.f32.vlgmr.msra.gmra.mxu1 %vm34_vm3, %v231_v33 }
 0x2d3   :  { %v317_v38 = vpop.permute.xlu0 %316 }
 0x390   :  { %v303_v34 = vpop.f32.mrf.mxu1 }
 0x391   :  { %392 = vtanh.f32 %v303_v34 }
 0x392   :  { %v376_v35 = vpop.f32.mrf.mxu1 }
 0x39e   :  { %v393_v36 = vpop.eup %392 }
 0x39f   :  { %309 = vst.msk [vmem:[#allocation2] sm:$0xff] %vm308_vm4, %v393_v36 }
 0x3a0   :  { %314 = vst.msk [vmem:[#allocation2] sm:$0xff] %vm313_vm5, %v311_v37 }
 0x3a1   :  { %320 = vst.msk [vmem:[#allocation2] sm:$0xff] %vm319_vm6, %v317_v38 }
 0x3a2   :  { %405 = shalt.err (!%p402_p4)
}
 0x3a3   :  { %330 = dma.vmem_to_hbm [thread:$0]  %s328_s23, 128, %s513_s7, [#allocation3]  }
 0x3a4   :  { %414 = dma.done.wait [#allocation3], 128  }
 0x3a5   :  { %415 = vsyncadd [#allocation3], 4294967168 }
 0x3a6   :  { %334 = vsyncpa [#allocation3], 1 }

</bundles_post_ra>
